<compile_context>
chip_gen: v7x
topology: tpu7x:2x2x1
jax: 0.10.0
libtpu: 0.0.40
codegen_flags: <defaults>
</compile_context>

<pallas_src>
import jax
import jax.numpy as jnp
from jax.experimental import pallas as pl
from jax.experimental.pallas import tpu as pltpu


_TILE_VMEM_BUDGET = 32 << 20   # bytes allowed for double-buffered input+output tiles
_VMEM_LIMIT_BYTES = 48 << 20   # scoped VMEM limit: > v5e/v6e defaults, < v7x 64 MiB physical
_MIN_GRID_STEPS = 4            # >= 2 pipelined steps per TensorCore on v7x megacore
_TARGET_STEP_BYTES = 2 << 20   # fatten grid steps until each moves ~2 MiB


def _cdiv(a, b):
    return -(-a // b)


def _select_tiles(N, C_in, C_out, HW, in_bytes, out_bytes, budget_bytes):
    """Pick (batch_block bb, spatial tile tm) for out[C_out, tm] = W @ x[C_in, tm]."""
    # Double-buffered bytes moved per spatial column, per batch element in the block.
    per_col = 2 * (C_in * in_bytes + C_out * out_bytes)
    max_cols = max(128, budget_bytes // per_col)

    # Spatial tile: full extent if it fits; otherwise the largest multiple of 128 within
    # the VMEM budget. A single masked edge tile beats making every tile narrow.
    if HW <= max_cols:
        tm = HW
    else:
        tm = max(128, (min(max_cols, HW) // 128) * 128)
    num_m = _cdiv(HW, tm)

    # Keep both v7x TensorCores busy and give the pipeline >= 2 steps per core, but never
    # split a large HW into sub-512-column tiles (per-step overhead dominates below that).
    if N * num_m < _MIN_GRID_STEPS and HW >= 2 * 128:
        want_m = _cdiv(_MIN_GRID_STEPS, N)
        cand = max(128, (_cdiv(HW, want_m) // 128) * 128)
        if (cand >= 512 or HW <= 4 * 512) and _cdiv(HW, cand) > num_m:
            tm = cand
            num_m = _cdiv(HW, tm)

    # Batch blocking: if one batch element per step moves too little data, pack several
    # batch elements into each grid step (one MXU dot per element inside the kernel).
    bb = 1
    if N > 1:
        step_bytes = per_col * tm
        if step_bytes < _TARGET_STEP_BYTES:
            bb = int(min(N, max(1, _TARGET_STEP_BYTES // max(step_bytes, 1))))
            min_steps = min(_MIN_GRID_STEPS, N * num_m)
            while bb > 1 and _cdiv(N, bb) * num_m < min_steps:
                bb -= 1
            while bb > 1 and bb * per_col * tm > budget_bytes:
                bb -= 1
    return bb, tm


def _linear_block_kernel(x_ref, w_ref, shift_ref, o_ref):
    # x_ref:     (BB, C_in, TM)  lane-dense spatial tiles of BB batch elements
    # w_ref:     (C_out, C_in)   1x1 conv weight with BN scale folded in (grid-resident)
    # shift_ref: (C_out, 1)      BN shift = beta - mean * scale
    # o_ref:     (BB, C_out, TM)
    w = w_ref[...]
    shift = shift_ref[...]
    for i in range(x_ref.shape[0]):  # static unroll over the (small) batch block
        acc = jnp.dot(w, x_ref[i], preferred_element_type=jnp.float32)
        o_ref[i] = (acc + shift).astype(o_ref.dtype)


def linear_block_forward(x_nchw, conv_w, bn_gamma, bn_beta, bn_mean, bn_var, eps=1e-5):
    """Conv2d(in_c, out_c, kernel=1, stride=1, pad=0, groups=1, bias=False) + BatchNorm2d (eval).

    x_nchw:  (N, C_in, H, W)
    conv_w:  (C_out, C_in, 1, 1)   -- PyTorch Conv2d weight layout
    bn_*:    (C_out,)
    returns: (N, C_out, H, W)
    """
    N, C_in, H, W = x_nchw.shape
    C_out = conv_w.shape[0]
    HW = H * W

    # NCHW -> (N, C_in, H*W): a free reshape, no transposes in this layout.
    x_flat = x_nchw.reshape(N, C_in, HW)

    # Fold BN scale into the tiny conv weight once, outside the kernel (fold math in f32).
    scale = bn_gamma.astype(jnp.float32) / jnp.sqrt(bn_var.astype(jnp.float32) + eps)
    w_scaled = (conv_w.reshape(C_out, C_in).astype(jnp.float32) * scale[:, None]).astype(
        x_nchw.dtype
    )
    shift = (bn_beta.astype(jnp.float32) - bn_mean.astype(jnp.float32) * scale).reshape(
        C_out, 1
    )

    itemsize = jnp.dtype(x_nchw.dtype).itemsize
    bb, tm = _select_tiles(N, C_in, C_out, HW, itemsize, itemsize, _TILE_VMEM_BUDGET)
    grid = (_cdiv(N, bb), _cdiv(HW, tm))

    out = pl.pallas_call(
        _linear_block_kernel,
        out_shape=jax.ShapeDtypeStruct((N, C_out, HW), x_nchw.dtype),
        grid_spec=pl.GridSpec(
            grid=grid,
            in_specs=[
                # (bb, C_in, tm) batch-blocked, lane-dense spatial tile
                pl.BlockSpec((bb, C_in, tm), lambda n, m: (n, 0, m)),
                # weight & shift are tiny, constant across the grid -> stay VMEM-resident
                pl.BlockSpec((C_out, C_in), lambda n, m: (0, 0)),
                pl.BlockSpec((C_out, 1), lambda n, m: (0, 0)),
            ],
            out_specs=pl.BlockSpec((bb, C_out, tm), lambda n, m: (n, 0, m)),
        ),
        compiler_params=pltpu.CompilerParams(
            dimension_semantics=("parallel", "parallel"),
            vmem_limit_bytes=_VMEM_LIMIT_BYTES,
        ),
    )(x_flat, w_scaled, shift)

    # (N, C_out, H*W) -> NCHW, another free reshape.
    return out.reshape(N, C_out, H, W)


if __name__ == "__main__":
    key = jax.random.PRNGKey(0)
    k_x, k_w, k_g, k_b, k_m, k_v = jax.random.split(key, 6)

    # Small shapes consistent with the module (1x1 conv block)
    N, C_in, C_out, Hh, Ww = 2, 4, 8, 16, 16

    x = jax.random.normal(k_x, (N, C_in, Hh, Ww), dtype=jnp.float32)
    conv_w = jax.random.normal(k_w, (C_out, C_in, 1, 1), dtype=jnp.float32) * 0.1
    bn_gamma = jax.random.uniform(k_g, (C_out,), dtype=jnp.float32, minval=0.5, maxval=1.5)
    bn_beta = jax.random.normal(k_b, (C_out,), dtype=jnp.float32) * 0.1
    bn_mean = jax.random.normal(k_m, (C_out,), dtype=jnp.float32) * 0.1
    bn_var = jax.random.uniform(k_v, (C_out,), dtype=jnp.float32, minval=0.5, maxval=1.5)

    out = linear_block_forward(x, conv_w, bn_gamma, bn_beta, bn_mean, bn_var)
    jax.block_until_ready(out)

    # Pure-JAX reference check (1x1 conv == einsum over channels, then BN affine)
    ref = jnp.einsum("nchw,oc->nohw", x, conv_w.reshape(C_out, C_in))
    scale = bn_gamma / jnp.sqrt(bn_var + 1e-5)
    shift = bn_beta - bn_mean * scale
    ref = ref * scale[None, :, None, None] + shift[None, :, None, None]
    assert out.shape == (N, C_out, Hh, Ww)
    assert jnp.allclose(out, ref, atol=1e-4, rtol=1e-4)

    print("KERNEL_OK")
</pallas_src>

<mosaic_0001>
module attributes {stable_mosaic.version = 11 : i64} {
  func.func @_linear_block_kernel(%arg0: i32, %arg1: i32, %arg2: memref<1x4x128xf32, #tpu.memory_space<vmem>>, %arg3: memref<8x4xf32, #tpu.memory_space<vmem>>, %arg4: memref<8x1xf32, #tpu.memory_space<vmem>>, %arg5: memref<1x8x128xf32, #tpu.memory_space<vmem>>) attributes {dimension_semantics = [#tpu.dimension_semantics<parallel>, #tpu.dimension_semantics<parallel>], iteration_bounds = array<i64: 2, 2>, scalar_prefetch = 0 : i64, scratch_operands = 0 : i64, tpu.core_type = #tpu.core_type<tc>, window_params = [{transform_indices = @transform_0, window_bounds = array<i64: 1, 4, 128>}, {pipeline_mode = #tpu.pipeline_mode<synchronous>, transform_indices = @transform_1, window_bounds = array<i64: 8, 4>}, {pipeline_mode = #tpu.pipeline_mode<synchronous>, transform_indices = @transform_2, window_bounds = array<i64: 8, 1>}, {transform_indices = @transform_3, window_bounds = array<i64: 1, 8, 128>}]} {
    %c0 = arith.constant 0 : index
    %c0_0 = arith.constant 0 : index
    %0 = vector.load %arg3[%c0, %c0_0] : memref<8x4xf32, #tpu.memory_space<vmem>>, vector<8x4xf32>
    %c0_1 = arith.constant 0 : index
    %c0_2 = arith.constant 0 : index
    %1 = vector.load %arg4[%c0_1, %c0_2] : memref<8x1xf32, #tpu.memory_space<vmem>>, vector<8x1xf32>
    %c0_3 = arith.constant 0 : index
    %c0_4 = arith.constant 0 : index
    %c0_5 = arith.constant 0 : index
    %2 = vector.load %arg2[%c0_3, %c0_4, %c0_5] : memref<1x4x128xf32, #tpu.memory_space<vmem>>, vector<1x4x128xf32>
    %3 = vector.shape_cast %2 : vector<1x4x128xf32> to vector<4x128xf32>
    %cst = arith.constant dense<0.000000e+00> : vector<8x128xf32>
    %4 = tpu.matmul %0, %3, %cst {dimension_numbers = #tpu.dot_dimension_numbers<[1], [0], [0], [1], [0, 0, 1, 1], [], []>} : vector<8x4xf32>, vector<4x128xf32>, vector<8x128xf32> -> vector<8x128xf32>
    %5 = vector.broadcast %1 : vector<8x1xf32> to vector<8x128xf32>
    %6 = arith.addf %4, %5 : vector<8x128xf32>
    %c0_6 = arith.constant 0 : index
    %c0_7 = arith.constant 0 : index
    %c0_8 = arith.constant 0 : index
    %7 = vector.load %arg5[%c0_6, %c0_7, %c0_8] : memref<1x8x128xf32, #tpu.memory_space<vmem>>, vector<1x8x128xf32>
    %8 = vector.shape_cast %7 : vector<1x8x128xf32> to vector<8x128xf32>
    %9 = vector.shape_cast %6 : vector<8x128xf32> to vector<1x8x128xf32>
    tpu.vector_store %arg5[%c0_6, %c0_7, %c0_8], %9 {strides = array<i32>} : memref<1x8x128xf32, #tpu.memory_space<vmem>>, vector<1x8x128xf32>,
    return
  }
  func.func @transform_0(%arg0: i32, %arg1: i32) -> (i32, i32, i32) {
    %c0_i32 = arith.constant 0 : i32
    %c0_i32_0 = arith.constant 0 : i32
    return %arg0, %c0_i32, %arg1 : i32, i32, i32
  }
  func.func @transform_1(%arg0: i32, %arg1: i32) -> (i32, i32) {
    %c0_i32 = arith.constant 0 : i32
    %c0_i32_0 = arith.constant 0 : i32
    %c0_i32_1 = arith.constant 0 : i32
    return %c0_i32, %c0_i32_0 : i32, i32
  }
  func.func @transform_2(%arg0: i32, %arg1: i32) -> (i32, i32) {
    %c0_i32 = arith.constant 0 : i32
    %c0_i32_0 = arith.constant 0 : i32
    %c0_i32_1 = arith.constant 0 : i32
    return %c0_i32, %c0_i32_0 : i32, i32
  }
  func.func @transform_3(%arg0: i32, %arg1: i32) -> (i32, i32, i32) {
    %c0_i32 = arith.constant 0 : i32
    %c0_i32_0 = arith.constant 0 : i32
    return %arg0, %c0_i32, %arg1 : i32, i32, i32
  }
}

</mosaic_0001>

<bundles_post_ra>
// kernel: tpu_custom_call.1
= control target key start
LH: loop header
LB: loop body
LE: loop exit
PB: predicated region body
PF: predicated region fallthrough
CT: control target
= control target key end

     0   :  { %8 = vsyncpa [#allocation3], 0  ;;  %s735_s0 = inlined_call_operand.vmem [shape: f32[2,4,256], index: 0, kind: input, shape index: {}]   ;;  %s736_s1 = inlined_call_operand.vmem [shape: f32[8,4], index: 1, kind: input, shape index: {}]   ;;  %s737_s2 = inlined_call_operand.vmem [shape: f32[8,1], index: 2, kind: input, shape index: {}]   ;;  %s738_s3 = inlined_call_operand.hbm [shape: f32[2,8,256], index: 3, kind: output, shape index: {}]  }
   0x1   :  { %10 = vsyncpa [#allocation3 + $0x1], 0  ;;  %s592_s12 = smov 0   ;;  %s594_s13 = smov 0  }
   0x2   :  { %s596_s14 = smov 0   ;;  %s598_s15 = smov 0  }
   0x3   :  { %s600_s16 = smov 0   ;;  %s602_s17 = smov 0  }
   0x4   :  { %s604_s18 = smov 0   ;;  %s606_s19 = smov 0  }
   0x5 LB: > { %s375_s20 = sadd.s32 4294967295, %s566_s19   ;;  %s376_s21 = sadd.s32 4294967294, %s566_s19   ;;  %s566_s19 = sphi %s606_s19, %s16_s19   ;;  %s562_s18 = sphi %s604_s18, %s747_s18   ;;  %s558_s17 = sphi %s602_s17, %s746_s17   ;;  %s554_s16 = sphi %s600_s16, %s745_s16   ;;  %s550_s15 = sphi %s598_s15, %s744_s15   ;;  %s546_s14 = sphi %s596_s14, %s743_s14   ;;  %s542_s13 = sphi %s594_s13, %s742_s13   ;;  %s538_s12 = sphi %s592_s12, %s741_s12  }
   0x6   : > { %s25_s22 = sadd.s32 1, %s558_s17  ;;  %s28_s23 = sadd.s32 1, %s562_s18 }
   0x7   : > { %p26_p0 = scmp.ge.s32.totalorder %s25_s22, 2  ;;  %p117_p1 = scmp.ne.s32.totalorder %s546_s14, %s542_s13 }
   0x8   : > { %p118_p2 = scmp.eq.s32.totalorder %s375_s20, 3  ;;  %p123_p5 = scmp.ne.s32.totalorder %s542_s13, %s538_s12 }
   0x9   : > { %s749_s22 = smov (%p26_p0, %s25_s22), 0  ;;  %s751_s23 = smov (!%p26_p0, %s28_s23), %s562_s18 }
   0xa   : > { %s103_s24 = ssub.s32 %s558_s17, %s749_s22  ;;  %p643_p3 = por %p118_p2, %p117_p1 }
   0xb   : > { %p30_p4 = scmp.ge.s32.totalorder %s751_s23, 2  ;;  %p124_p6 = scmp.eq.s32.totalorder %s376_s21, 3 }
   0xc   : > { %p379_p7 = scmp.ge.s32.totalorder %s566_s19, 1  ;;  %p159_p9 = scmp.lt.s32.totalorder %s566_s19, 5 }
   0xd   : > { %s753_s23 = smov (%p30_p4, %s751_s23), 0  ;;  %p652_p8 = por %p124_p6, %p123_p5 }
   0xe   : > { %s102_s27 = ssub.s32 %s562_s18, %s753_s23  ;;  %s107_s28 = sadd.s32 1, %s546_s14 }
   0xf   : > { %s104_s29 = sor.u32 %s103_s24, %s102_s27  ;;  %p160_p10 = pnand %p379_p7, %p159_p9 }
  0x10   : > { %p105_p11 = scmp.eq.s32.totalorder %s104_s29, 0  ;;  %p186_p12 = scmp.lt.s32.totalorder (!%p160_p10), %s554_s16, 1  ;;  %v568_v0 = vmov (!%p160_p10), 0.0   ;;  %vm569_vm0 = vmmov (!%p160_p10), 0   ;;  %v195_v1 = vld [vmem:[%s737_s2] sm:$0xff] (!%p160_p10)  ;;  %v570_v2 = vmov (!%p160_p10), 0  }
  0x11   : > { %163 = sbr.rel (%p160_p10) target bundleno = 260 (0x104), region = 32  ;;  %p188_p13 = scmp.lt.s32.totalorder (!%p160_p10), %s550_s15, 1  ;;  %392 = vmatprep.subr.mxu0 (!%p160_p10), %v568_v0  ;;  %394 = vmatprep.mubr.msk.f32.mxu0 (!%p160_p10), %vm569_vm0, %v568_v0  ;;  %vm206_vm1 = vcmask (!%p160_p10), 1043456   ;;  %v194_v3 = vld [vmem:[%s736_s1] sm:$0xff] (!%p160_p10)  ;;  %vm202_vm2 = vcmask (!%p160_p10), 31744  }
  0x12   : > { %s661_s30 = scalar_select %p105_p11, %s546_s14, %s107_s28  }
  0x13   : > { %471 = vset.pattern.permute.xlu0 (!%p160_p10), %v570_v2  ;;  %s183_s28 = sand.u32 (!%p160_p10), 1, %s542_s13   ;;  %s386_s4 = sshll.u32 (!%p160_p10), %s554_s16, 1 }
  0x14   : > { %199 = vperm.xlu0 (!%p160_p10), %471, %v195_v1   ;;  %s380_s29 = sshll.u32 (!%p160_p10), %s183_s28, 3  ;;  %s293_s5 = sadd.s32 (!%p160_p10), %s550_s15, %s386_s4 }
  0x15   : > { %s571_s20 = smov (!%p160_p10), [#allocation2]  }
  0x18   : > { %s187_s6 = scalar_select %p186_p12, %s554_s16, 1 }
  0x19   : > { %s189_s7 = scalar_select %p188_p13, %s550_s15, 1 }
  0x1a   : > { %s381_s8 = sshll.u32 %s187_s6, 1  ;;  %s387_s6 = sshll.u32 %s293_s5, 7 }
  0x1b   : > { %s191_s9 = sadd.s32 %s381_s8, %s189_s7  ;;  %s185_s7 = scalar_lea.vmem [#allocation2], %s380_s29 }
  0x1c   : > { %s382_s10 = sshll.u32 %s191_s9, 2  ;;  %s297_s8 = sshll.u32 %s185_s7, 4  ;;  %s684_s8 = int_to_ptr.vmem [resolvable:$true] %s297_s8 }
  0x1d   : > { %s193_s21 = scalar_lea.vmem %s735_s0, %s382_s10  ;;  %s682_s11 = scalar_lea.hbm %s738_s3, %s387_s6 }
  0x1e   : > { %v196_v4 = vld [vmem:[%s193_s21] sm:$0xf]  ;;  %s282_s16 = scalar_lea.sflag [#allocation3], %s183_s28  ;;  %s472_s15 = scalar_lea.vmem %s684_s8, 128 }
  0x1f   : > { %393 = vmatpush3.msk.msra.mxu0 %vm206_vm1, %v196_v4  ;;  %p473_p0 = scmp.ne.s32.totalorder %s684_s8, %s472_s15  ;;  %s476_s21 = sshll.u32 %s571_s20, 4  ;;  %s477_s21 = int_to_ptr.vmem [resolvable:$false] %s476_s21 }
  0x20   : > { %395 = vmatmul.mubr.msk.f32.vlgmr.msra.gmra.mrb[0].mxu0 %vm202_vm2, %v194_v3  ;;  %s478_s24 = scalar_lea.vmem %s477_s21, 256  ;;  %p479_p4 = scmp.lt.s32.totalorder %s684_s8, %s477_s21 }
  0x21   : > { %p474_p1 = pnand %p473_p0, %p643_p3  ;;  %p480_p5 = scmp.lt.s32.totalorder %s478_s24, %s472_s15 }
  0x23   : > { %p475_p2 = pneg %p474_p1  ;;  %p481_p6 = por %p480_p5, %p479_p4 }
  0x25   : > { %p482_p7 = pnand %p481_p6, %p475_p2 }
  0x93   : > { %v200_v5 = vpop.permute.xlu0 %199 }
  0xf3   : > { %v276_v6 = vpop.f32.mrb[0].mxu0 }
  0xf4   : > { %v277_v7 = vadd.f32 %v276_v6, %v200_v5  ;;  %v396_v8 = vpop.f32.mrb[1].mxu0 }
  0xf6   : > { %280 = vst [vmem:[%s185_s7] sm:$0xff] %v277_v7 }
  0xf7   : > { %485 = shalt.err (!%p482_p7)
}
  0xf8   : > { %s486_s27 = scalar_lea.hbm %s682_s11, 128  ;;  %s490_s4 = scalar_lea.hbm %s738_s3, 512 }
  0xf9   : > { %p487_p9 = scmp.ne.s32.totalorder %s682_s11, %s486_s27  ;;  %p491_p12 = scmp.lt.u32.totalorder %s682_s11, %s738_s3 }
  0xfa   : > { %p492_p13 = scmp.lt.u32.totalorder %s490_s4, %s486_s27  ;;  %p494_p1 = scmp.lt.u32.totalorder %s486_s27, %s682_s11 }
  0xfb   : > { %p488_p10 = pnand %p487_p9, %p643_p3 }
  0xfc   : > { %p493_p0 = por %p492_p13, %p491_p12 }
  0xfd   : > { %p489_p11 = pneg %p488_p10 }
  0xfe   : > { %p495_p2 = por %p494_p1, %p493_p0 }
 0x100   : > { %p496_p4 = pnand %p495_p2, %p489_p11 }
 0x102   : > { %499 = shalt.err (!%p496_p4)
}
 0x103   : > { %397 = dma.vmem_to_hbm [thread:$0]  (%p643_p3), %s684_s8, 128, %s682_s11, %s282_s16  }
 0x104 PF: > { %p403_p5 = scmp.ge.s32.totalorder %s566_s19, 2  ;;  %s309_s7 = sand.u32 1, %s538_s12  }
 0x105   : > { %s310_s9 = scalar_lea.sflag [#allocation3], %s309_s7 }
 0x106   : > { %p400_p6 = pnand %p403_p5, %p652_p8 }
 0x108   : > { %533 = dma.done.wait (!%p400_p6), %s310_s9, 128  }
 0x109   : > { %535 = vsyncadd (!%p400_p6), %s310_s9, 4294967168  ;;  %s16_s19 = sadd.s32 1, %s566_s19   ;;  %s741_s12 = smov %s542_s13 }
 0x10a   : > { %p13_p7 = scmp.ge.s32.totalorder %s16_s19, 6   ;;  %s742_s13 = smov %s546_s14 }
 0x10b   : > { %s743_s14 = smov %s661_s30  ;;  %s744_s15 = smov %s558_s17 }
 0x10c   : > { %s745_s16 = smov %s562_s18  ;;  %s746_s17 = smov %s749_s22 }
 0x10d   : > { %s747_s18 = smov %s753_s23  ;;  %15 = sbr.rel (!%p13_p7) target bundleno = 5 (0x5), region = 67 }
 0x114   :  { %315 = vsyncpa [#allocation3], 1 }
 0x115   :  { %317 = vsyncpa [#allocation3 + $0x1], 1 }

</bundles_post_ra>
